<compile_context>
chip_gen: v7x
topology: tpu7x:2x2x1
jax: 0.10.0
libtpu: 0.0.40
codegen_flags: <defaults>
</compile_context>

<pallas_src>
import functools

import numpy as np
import jax
import jax.numpy as jnp
from jax import lax
from jax.experimental import pallas as pl
from jax.experimental.pallas import tpu as pltpu


# ------------------------------ fused kernel --------------------------------
def scarf_kernel(x_ref, wm_ref, bm_ref, w1_ref, b1_ref, w2_ref, b2_ref,
                 *out_refs, tau, compute_loss):
    M, B, _ = x_ref.shape
    L = wm_ref.shape[2]
    z_ref = out_refs[0]

    # --- per-view Linear embeddings + projector layer 1, fused -------------
    # torch: h = cat([mapping_m(X_m) for m], dim=1);  h @ W1
    #      == sum_m (X_m @ Wm_m + bm_m) @ W1[m*L:(m+1)*L, :]
    acc = jnp.zeros((B, L), jnp.float32)
    for m in range(M):  # static unroll; M is tiny
        h_m = jnp.dot(x_ref[m], wm_ref[m],
                      preferred_element_type=jnp.float32) + bm_ref[m]
        acc = acc + jnp.dot(h_m, w1_ref[m * L:(m + 1) * L, :],
                            preferred_element_type=jnp.float32)
    hh = jnp.maximum(acc + b1_ref[...], 0.0)                       # ReLU
    z = jnp.dot(hh, w2_ref[...], preferred_element_type=jnp.float32) + b2_ref[...]
    z_ref[...] = z.astype(z_ref.dtype)

    if not compute_loss:
        return

    # --- eval-mode contrastive loss: sims = sim_func(z, z), CE(labels=arange) ---
    loss_ref = out_refs[1]
    # F.normalize(z, dim=1): z / max(||z||, 1e-12)  ==  z * rsqrt(max(||z||^2, 1e-24))
    sq = jnp.sum(z * z, axis=1, keepdims=True)
    zn = z * lax.rsqrt(jnp.maximum(sq, 1e-24))
    sims = lax.dot_general(zn, zn, (((1,), (1,)), ((), ())),
                           preferred_element_type=jnp.float32) / tau   # (B, B)
    # cross_entropy(sims, arange(B)) = mean(logsumexp(row) - sims[i, i])
    mmax = jnp.max(sims, axis=1, keepdims=True)
    lse = mmax + jnp.log(jnp.sum(jnp.exp(sims - mmax), axis=1, keepdims=True))
    row = lax.broadcasted_iota(jnp.int32, (B, B), 0)
    col = lax.broadcasted_iota(jnp.int32, (B, B), 1)
    diag = jnp.sum(jnp.where(row == col, sims, 0.0), axis=1, keepdims=True)
    loss_ref[0, 0] = jnp.mean(lse - diag)


# ------------------------------- forward glue --------------------------------
def scarf_forward(Xs, params, tau, calc_loss=True):
    """Xs: (M, B, D) stacked per-view inputs (each mapping is Linear(D -> L))."""
    M, B, _ = Xs.shape
    L = params["Wm"].shape[-1]
    # TODO(synk): training-mode corrupt_view (random.shuffle + torch.randint row
    # resampling) is nondeterministic and not implemented; loss follows the
    # eval path sims = sim_func(z, z) of the reference module.
    kernel = functools.partial(scarf_kernel, tau=float(tau), compute_loss=calc_loss)

    out_shape = [jax.ShapeDtypeStruct((B, L), jnp.float32)]
    out_specs = [pl.BlockSpec(memory_space=pltpu.MemorySpace.VMEM)]
    if calc_loss:
        out_shape.append(jax.ShapeDtypeStruct((1, 1), jnp.float32))
        out_specs.append(pl.BlockSpec(memory_space=pltpu.MemorySpace.SMEM))

    outs = pl.pallas_call(
        kernel,
        out_shape=tuple(out_shape),
        in_specs=[pl.BlockSpec(memory_space=pltpu.MemorySpace.VMEM)] * 7,
        out_specs=tuple(out_specs),
    )(Xs, params["Wm"], params["bm"],
      params["W1"], params["b1"], params["W2"], params["b2"])

    if calc_loss:
        z, loss = outs
        return z, loss[0, 0]
    (z,) = outs
    return z, None


# -------------------------- pure-JAX reference check -------------------------
def reference(Xs, params, tau):
    M, B, _ = Xs.shape
    H = jnp.einsum("mbd,mdl->mbl", Xs, params["Wm"]) + params["bm"]      # (M,B,L)
    h = jnp.transpose(H, (1, 0, 2)).reshape(B, -1)                       # cat(dim=1)
    hh = jnp.maximum(h @ params["W1"] + params["b1"], 0.0)
    z = hh @ params["W2"] + params["b2"]
    zn = z / jnp.maximum(jnp.linalg.norm(z, axis=1, keepdims=True), 1e-12)
    sims = zn @ zn.T / tau
    lse = jax.scipy.special.logsumexp(sims, axis=1)
    loss = jnp.mean(lse - jnp.diag(sims))
    return z, loss


if __name__ == "__main__":
    # module config: M=4 mappings (views), each Linear(D=16 -> latent L=32), tau=1.0
    B, D, L, M = 8, 16, 32, 4
    tau = 1.0
    Kin = M * L  # projector input dim = latent_dim * M

    key = jax.random.PRNGKey(0)
    ks = jax.random.split(key, 7)
    Xs = jax.random.normal(ks[0], (M, B, D), jnp.float32)

    # deterministic PyTorch-Linear-style init: U(-1/sqrt(fan_in), 1/sqrt(fan_in))
    def uinit(k, shape, fan_in):
        bound = 1.0 / np.sqrt(fan_in)
        return jax.random.uniform(k, shape, jnp.float32, -bound, bound)

    params = dict(
        Wm=uinit(ks[1], (M, D, L), D),     # per-view mapping weights
        bm=uinit(ks[2], (M, 1, L), D),     # per-view mapping biases
        W1=uinit(ks[3], (Kin, L), Kin),    # projector hidden layer
        b1=uinit(ks[4], (1, L), Kin),
        W2=uinit(ks[5], (L, L), L),        # projector output layer
        b2=uinit(ks[6], (1, L), L),
    )

    z, loss = scarf_forward(Xs, params, tau, calc_loss=True)
    jax.block_until_ready((z, loss))

    z_ref_, loss_ref_ = reference(Xs, params, tau)
    assert z.shape == (B, L) and bool(jnp.isfinite(loss))
    np.testing.assert_allclose(np.asarray(z), np.asarray(z_ref_), rtol=1e-2, atol=1e-2)
    np.testing.assert_allclose(float(loss), float(loss_ref_), rtol=1e-2, atol=1e-2)

    # calc_loss=False path (loss is None, z unchanged)
    z2, loss2 = scarf_forward(Xs, params, tau, calc_loss=False)
    jax.block_until_ready(z2)
    assert loss2 is None
    np.testing.assert_allclose(np.asarray(z2), np.asarray(z), rtol=1e-6, atol=1e-6)

    print("KERNEL_OK")
</pallas_src>

<mosaic_0001>
module attributes {stable_mosaic.version = 11 : i64} {
  func.func @scarf_kernel(%arg0: memref<4x8x16xf32, #tpu.memory_space<vmem>>, %arg1: memref<4x16x32xf32, #tpu.memory_space<vmem>>, %arg2: memref<4x1x32xf32, #tpu.memory_space<vmem>>, %arg3: memref<128x32xf32, #tpu.memory_space<vmem>>, %arg4: memref<1x32xf32, #tpu.memory_space<vmem>>, %arg5: memref<32x32xf32, #tpu.memory_space<vmem>>, %arg6: memref<1x32xf32, #tpu.memory_space<vmem>>, %arg7: memref<8x32xf32, #tpu.memory_space<vmem>>, %arg8: memref<1x1xf32, #tpu.memory_space<smem>>) attributes {dimension_semantics = [], scalar_prefetch = 0 : i64, scratch_operands = 0 : i64, tpu.core_type = #tpu.core_type<tc>} {
    %cst = arith.constant 0.000000e+00 : f32
    %0 = vector.broadcast %cst : f32 to vector<8x32xf32>
    %c0 = arith.constant 0 : index
    %c0_0 = arith.constant 0 : index
    %c0_1 = arith.constant 0 : index
    %1 = vector.load %arg0[%c0, %c0_0, %c0_1] : memref<4x8x16xf32, #tpu.memory_space<vmem>>, vector<1x8x16xf32>
    %2 = vector.shape_cast %1 : vector<1x8x16xf32> to vector<8x16xf32>
    %c0_2 = arith.constant 0 : index
    %c0_3 = arith.constant 0 : index
    %c0_4 = arith.constant 0 : index
    %3 = vector.load %arg1[%c0_2, %c0_3, %c0_4] : memref<4x16x32xf32, #tpu.memory_space<vmem>>, vector<1x16x32xf32>
    %4 = vector.shape_cast %3 : vector<1x16x32xf32> to vector<16x32xf32>
    %cst_5 = arith.constant dense<0.000000e+00> : vector<8x32xf32>
    %5 = tpu.matmul %2, %4, %cst_5 {dimension_numbers = #tpu.dot_dimension_numbers<[1], [0], [0], [1], [0, 0, 1, 1], [], []>} : vector<8x16xf32>, vector<16x32xf32>, vector<8x32xf32> -> vector<8x32xf32>
    %c0_6 = arith.constant 0 : index
    %c0_7 = arith.constant 0 : index
    %c0_8 = arith.constant 0 : index
    %6 = vector.load %arg2[%c0_6, %c0_7, %c0_8] : memref<4x1x32xf32, #tpu.memory_space<vmem>>, vector<1x1x32xf32>
    %7 = vector.shape_cast %6 : vector<1x1x32xf32> to vector<1x32xf32>
    %8 = vector.broadcast %7 : vector<1x32xf32> to vector<8x32xf32>
    %9 = arith.addf %5, %8 : vector<8x32xf32>
    %c0_9 = arith.constant 0 : index
    %c0_10 = arith.constant 0 : index
    %10 = vector.load %arg3[%c0_9, %c0_10] : memref<128x32xf32, #tpu.memory_space<vmem>>, vector<32x32xf32>
    %cst_11 = arith.constant dense<0.000000e+00> : vector<8x32xf32>
    %11 = tpu.matmul %9, %10, %cst_11 {dimension_numbers = #tpu.dot_dimension_numbers<[1], [0], [0], [1], [0, 0, 1, 1], [], []>} : vector<8x32xf32>, vector<32x32xf32>, vector<8x32xf32> -> vector<8x32xf32>
    %12 = arith.addf %0, %11 : vector<8x32xf32>
    %c1 = arith.constant 1 : index
    %c0_12 = arith.constant 0 : index
    %c0_13 = arith.constant 0 : index
    %13 = vector.load %arg0[%c1, %c0_12, %c0_13] : memref<4x8x16xf32, #tpu.memory_space<vmem>>, vector<1x8x16xf32>
    %14 = vector.shape_cast %13 : vector<1x8x16xf32> to vector<8x16xf32>
    %c1_14 = arith.constant 1 : index
    %c0_15 = arith.constant 0 : index
    %c0_16 = arith.constant 0 : index
    %15 = vector.load %arg1[%c1_14, %c0_15, %c0_16] : memref<4x16x32xf32, #tpu.memory_space<vmem>>, vector<1x16x32xf32>
    %16 = vector.shape_cast %15 : vector<1x16x32xf32> to vector<16x32xf32>
    %cst_17 = arith.constant dense<0.000000e+00> : vector<8x32xf32>
    %17 = tpu.matmul %14, %16, %cst_17 {dimension_numbers = #tpu.dot_dimension_numbers<[1], [0], [0], [1], [0, 0, 1, 1], [], []>} : vector<8x16xf32>, vector<16x32xf32>, vector<8x32xf32> -> vector<8x32xf32>
    %c1_18 = arith.constant 1 : index
    %c0_19 = arith.constant 0 : index
    %c0_20 = arith.constant 0 : index
    %18 = vector.load %arg2[%c1_18, %c0_19, %c0_20] : memref<4x1x32xf32, #tpu.memory_space<vmem>>, vector<1x1x32xf32>
    %19 = vector.shape_cast %18 : vector<1x1x32xf32> to vector<1x32xf32>
    %20 = vector.broadcast %19 : vector<1x32xf32> to vector<8x32xf32>
    %21 = arith.addf %17, %20 : vector<8x32xf32>
    %c32 = arith.constant 32 : index
    %c0_21 = arith.constant 0 : index
    %22 = vector.load %arg3[%c32, %c0_21] : memref<128x32xf32, #tpu.memory_space<vmem>>, vector<32x32xf32>
    %cst_22 = arith.constant dense<0.000000e+00> : vector<8x32xf32>
    %23 = tpu.matmul %21, %22, %cst_22 {dimension_numbers = #tpu.dot_dimension_numbers<[1], [0], [0], [1], [0, 0, 1, 1], [], []>} : vector<8x32xf32>, vector<32x32xf32>, vector<8x32xf32> -> vector<8x32xf32>
    %24 = arith.addf %12, %23 : vector<8x32xf32>
    %c2 = arith.constant 2 : index
    %c0_23 = arith.constant 0 : index
    %c0_24 = arith.constant 0 : index
    %25 = vector.load %arg0[%c2, %c0_23, %c0_24] : memref<4x8x16xf32, #tpu.memory_space<vmem>>, vector<1x8x16xf32>
    %26 = vector.shape_cast %25 : vector<1x8x16xf32> to vector<8x16xf32>
    %c2_25 = arith.constant 2 : index
    %c0_26 = arith.constant 0 : index
    %c0_27 = arith.constant 0 : index
    %27 = vector.load %arg1[%c2_25, %c0_26, %c0_27] : memref<4x16x32xf32, #tpu.memory_space<vmem>>, vector<1x16x32xf32>
    %28 = vector.shape_cast %27 : vector<1x16x32xf32> to vector<16x32xf32>
    %cst_28 = arith.constant dense<0.000000e+00> : vector<8x32xf32>
    %29 = tpu.matmul %26, %28, %cst_28 {dimension_numbers = #tpu.dot_dimension_numbers<[1], [0], [0], [1], [0, 0, 1, 1], [], []>} : vector<8x16xf32>, vector<16x32xf32>, vector<8x32xf32> -> vector<8x32xf32>
    %c2_29 = arith.constant 2 : index
    %c0_30 = arith.constant 0 : index
    %c0_31 = arith.constant 0 : index
    %30 = vector.load %arg2[%c2_29, %c0_30, %c0_31] : memref<4x1x32xf32, #tpu.memory_space<vmem>>, vector<1x1x32xf32>
    %31 = vector.shape_cast %30 : vector<1x1x32xf32> to vector<1x32xf32>
    %32 = vector.broadcast %31 : vector<1x32xf32> to vector<8x32xf32>
    %33 = arith.addf %29, %32 : vector<8x32xf32>
    %c64 = arith.constant 64 : index
    %c0_32 = arith.constant 0 : index
    %34 = vector.load %arg3[%c64, %c0_32] : memref<128x32xf32, #tpu.memory_space<vmem>>, vector<32x32xf32>
    %cst_33 = arith.constant dense<0.000000e+00> : vector<8x32xf32>
    %35 = tpu.matmul %33, %34, %cst_33 {dimension_numbers = #tpu.dot_dimension_numbers<[1], [0], [0], [1], [0, 0, 1, 1], [], []>} : vector<8x32xf32>, vector<32x32xf32>, vector<8x32xf32> -> vector<8x32xf32>
    %36 = arith.addf %24, %35 : vector<8x32xf32>
    %c3 = arith.constant 3 : index
    %c0_34 = arith.constant 0 : index
    %c0_35 = arith.constant 0 : index
    %37 = vector.load %arg0[%c3, %c0_34, %c0_35] : memref<4x8x16xf32, #tpu.memory_space<vmem>>, vector<1x8x16xf32>
    %38 = vector.shape_cast %37 : vector<1x8x16xf32> to vector<8x16xf32>
    %c3_36 = arith.constant 3 : index
    %c0_37 = arith.constant 0 : index
    %c0_38 = arith.constant 0 : index
    %39 = vector.load %arg1[%c3_36, %c0_37, %c0_38] : memref<4x16x32xf32, #tpu.memory_space<vmem>>, vector<1x16x32xf32>
    %40 = vector.shape_cast %39 : vector<1x16x32xf32> to vector<16x32xf32>
    %cst_39 = arith.constant dense<0.000000e+00> : vector<8x32xf32>
    %41 = tpu.matmul %38, %40, %cst_39 {dimension_numbers = #tpu.dot_dimension_numbers<[1], [0], [0], [1], [0, 0, 1, 1], [], []>} : vector<8x16xf32>, vector<16x32xf32>, vector<8x32xf32> -> vector<8x32xf32>
    %c3_40 = arith.constant 3 : index
    %c0_41 = arith.constant 0 : index
    %c0_42 = arith.constant 0 : index
    %42 = vector.load %arg2[%c3_40, %c0_41, %c0_42] : memref<4x1x32xf32, #tpu.memory_space<vmem>>, vector<1x1x32xf32>
    %43 = vector.shape_cast %42 : vector<1x1x32xf32> to vector<1x32xf32>
    %44 = vector.broadcast %43 : vector<1x32xf32> to vector<8x32xf32>
    %45 = arith.addf %41, %44 : vector<8x32xf32>
    %c96 = arith.constant 96 : index
    %c0_43 = arith.constant 0 : index
    %46 = vector.load %arg3[%c96, %c0_43] : memref<128x32xf32, #tpu.memory_space<vmem>>, vector<32x32xf32>
    %cst_44 = arith.constant dense<0.000000e+00> : vector<8x32xf32>
    %47 = tpu.matmul %45, %46, %cst_44 {dimension_numbers = #tpu.dot_dimension_numbers<[1], [0], [0], [1], [0, 0, 1, 1], [], []>} : vector<8x32xf32>, vector<32x32xf32>, vector<8x32xf32> -> vector<8x32xf32>
    %48 = arith.addf %36, %47 : vector<8x32xf32>
    %c0_45 = arith.constant 0 : index
    %c0_46 = arith.constant 0 : index
    %49 = vector.load %arg4[%c0_45, %c0_46] : memref<1x32xf32, #tpu.memory_space<vmem>>, vector<1x32xf32>
    %50 = vector.broadcast %49 : vector<1x32xf32> to vector<8x32xf32>
    %51 = arith.addf %48, %50 : vector<8x32xf32>
    %cst_47 = arith.constant 0.000000e+00 : f32
    %52 = vector.broadcast %cst_47 : f32 to vector<8x32xf32>
    %53 = arith.maximumf %51, %52 : vector<8x32xf32>
    %c0_48 = arith.constant 0 : index
    %c0_49 = arith.constant 0 : index
    %54 = vector.load %arg5[%c0_48, %c0_49] : memref<32x32xf32, #tpu.memory_space<vmem>>, vector<32x32xf32>
    %cst_50 = arith.constant dense<0.000000e+00> : vector<8x32xf32>
    %55 = tpu.matmul %53, %54, %cst_50 {dimension_numbers = #tpu.dot_dimension_numbers<[1], [0], [0], [1], [0, 0, 1, 1], [], []>} : vector<8x32xf32>, vector<32x32xf32>, vector<8x32xf32> -> vector<8x32xf32>
    %c0_51 = arith.constant 0 : index
    %c0_52 = arith.constant 0 : index
    %56 = vector.load %arg6[%c0_51, %c0_52] : memref<1x32xf32, #tpu.memory_space<vmem>>, vector<1x32xf32>
    %57 = vector.broadcast %56 : vector<1x32xf32> to vector<8x32xf32>
    %58 = arith.addf %55, %57 : vector<8x32xf32>
    %c0_53 = arith.constant 0 : index
    %c0_54 = arith.constant 0 : index
    %59 = vector.load %arg7[%c0_53, %c0_54] : memref<8x32xf32, #tpu.memory_space<vmem>>, vector<8x32xf32>
    tpu.vector_store %arg7[%c0_53, %c0_54], %58 {strides = array<i32>} : memref<8x32xf32, #tpu.memory_space<vmem>>, vector<8x32xf32>,
    %60 = arith.mulf %58, %58 : vector<8x32xf32>
    %cst_55 = arith.constant dense<0.000000e+00> : vector<8xf32>
    %61 = vector.multi_reduction <add>, %60, %cst_55 [1] : vector<8x32xf32> to vector<8xf32>
    %62 = vector.shape_cast %61 : vector<8xf32> to vector<8x1xf32>
    %cst_56 = arith.constant 1.000000e-24 : f32
    %63 = vector.broadcast %cst_56 : f32 to vector<8x1xf32>
    %64 = arith.maximumf %62, %63 : vector<8x1xf32>
    %65 = math.rsqrt %64 : vector<8x1xf32>
    %66 = vector.broadcast %65 : vector<8x1xf32> to vector<8x32xf32>
    %67 = arith.mulf %58, %66 : vector<8x32xf32>
    %cst_57 = arith.constant dense<0.000000e+00> : vector<8x8xf32>
    %68 = tpu.matmul %67, %67, %cst_57 {dimension_numbers = #tpu.dot_dimension_numbers<[1], [1], [0], [0], [0, 0, 1, 0], [], []>} : vector<8x32xf32>, vector<8x32xf32>, vector<8x8xf32> -> vector<8x8xf32>
    %cst_58 = arith.constant 1.000000e+00 : f32
    %69 = vector.broadcast %cst_58 : f32 to vector<8x8xf32>
    %70 = arith.divf %68, %69 : vector<8x8xf32>
    %cst_59 = arith.constant dense<0xFF800000> : vector<8xf32>
    %71 = vector.multi_reduction <maximumf>, %70, %cst_59 [1] : vector<8x8xf32> to vector<8xf32>
    %72 = vector.shape_cast %71 : vector<8xf32> to vector<8x1xf32>
    %73 = vector.broadcast %72 : vector<8x1xf32> to vector<8x8xf32>
    %74 = arith.subf %70, %73 : vector<8x8xf32>
    %75 = math.exp %74 : vector<8x8xf32>
    %cst_60 = arith.constant dense<0.000000e+00> : vector<8xf32>
    %76 = vector.multi_reduction <add>, %75, %cst_60 [1] : vector<8x8xf32> to vector<8xf32>
    %77 = vector.shape_cast %76 : vector<8xf32> to vector<8x1xf32>
    %78 = math.log %77 : vector<8x1xf32>
    %79 = arith.addf %72, %78 : vector<8x1xf32>
    %80 = tpu.iota {dimensions = array<i32: 0>} : vector<8x8xi32>
    %81 = tpu.iota {dimensions = array<i32: 1>} : vector<8x8xi32>
    %82 = arith.cmpi eq, %80, %81 : vector<8x8xi32>
    %cst_61 = arith.constant 0.000000e+00 : f32
    %83 = vector.broadcast %cst_61 : f32 to vector<8x8xf32>
    %84 = arith.select %82, %70, %83 : vector<8x8xi1>, vector<8x8xf32>
    %cst_62 = arith.constant dense<0.000000e+00> : vector<8xf32>
    %85 = vector.multi_reduction <add>, %84, %cst_62 [1] : vector<8x8xf32> to vector<8xf32>
    %86 = vector.shape_cast %85 : vector<8xf32> to vector<8x1xf32>
    %87 = arith.subf %79, %86 : vector<8x1xf32>
    %88 = vector.shape_cast %87 : vector<8x1xf32> to vector<1x8x1xf32>
    %cst_63 = arith.constant dense<0.000000e+00> : vector<1xf32>
    %89 = vector.multi_reduction <add>, %88, %cst_63 [1, 2] : vector<1x8x1xf32> to vector<1xf32>
    %90 = vector.shape_cast %89 : vector<1xf32> to vector<1x1x1xf32>
    %91 = vector.extract %90[0, 0, 0] : f32 from vector<1x1x1xf32>
    %cst_64 = arith.constant 8.000000e+00 : f32
    %92 = arith.divf %91, %cst_64 : f32
    %c0_65 = arith.constant 0 : index
    %c0_66 = arith.constant 0 : index
    %93 = memref.load %arg8[%c0_65, %c0_66] : memref<1x1xf32, #tpu.memory_space<smem>>
    memref.store %92, %arg8[%c0_65, %c0_66] : memref<1x1xf32, #tpu.memory_space<smem>>
    return
  }
}

</mosaic_0001>

<bundles_post_ra>
// kernel: tpu_custom_call.1
= control target key start
LH: loop header
LB: loop body
LE: loop exit
PB: predicated region body
PF: predicated region fallthrough
CT: control target
= control target key end

     0   :  { %14 = vsyncpa [#allocation3], 0  ;;  %v1170_v3 = vmov 0.0|0.0   ;;  %vm1171_vm0 = vmmov 0   ;;  %v1172_v7 = vmov 0.0   ;;  %vm40_vm1 = vcmask 130048   ;;  %s1409_s0 = inlined_call_operand.vmem [shape: f32[4,8,16], index: 0, kind: input, shape index: {}]   ;;  %s1410_s1 = inlined_call_operand.vmem [shape: f32[4,16,32], index: 1, kind: input, shape index: {}]   ;;  %s1411_s2 = inlined_call_operand.vmem [shape: f32[4,1,32], index: 2, kind: input, shape index: {}]   ;;  %s1412_s3 = inlined_call_operand.vmem [shape: f32[128,32], index: 3, kind: input, shape index: {}]   ;;  %s1413_s4 = inlined_call_operand.vmem [shape: f32[1,32], index: 4, kind: input, shape index: {}]   ;;  %s1414_s5 = inlined_call_operand.vmem [shape: f32[32,32], index: 5, kind: input, shape index: {}]   ;;  %s1415_s6 = inlined_call_operand.vmem [shape: f32[1,32], index: 6, kind: input, shape index: {}]   ;;  %s1416_s7 = inlined_call_operand.hbm [shape: f32[8,32], index: 7, kind: output, shape index: {0}]   ;;  %s1417_s8 = inlined_call_operand.hbm [shape: f32[1,1], index: 8, kind: output, shape index: {1}]  }
   0x1   :  { %v31_v0 = vld [vmem:[%s1410_s1] sm:$0xff]  ;;  %v32_v1 = vld [vmem:[%s1410_s1 + $0x8] sm:$0xff]  ;;  %v926_v2 = vld [vmem:[%s1410_s1 + $0x10] sm:$0xff]  ;;  %1079 = vmatprep.subr.bf16.mxu0 %v1170_v3  ;;  %1082 = vmatprep.subr.bf16.mxu1 %v1170_v3 }
   0x2   :  { %v1080_v4 = vpack.c.bf16 %v32_v1, %v31_v0  ;;  %v927_v5 = vld [vmem:[%s1410_s1 + $0x18] sm:$0xff]  ;;  %995 = vmatprep.mubr.msk.f32.mxu0 %vm1171_vm0, %v1172_v7  ;;  %1002 = vmatprep.mubr.msk.f32.mxu1 %vm1171_vm0, %v1172_v7  ;;  %v204_v8 = vld [vmem:[%s1412_s3 + $0x20] sm:$0xff]  ;;  %v205_v9 = vld [vmem:[%s1412_s3 + $0x28] sm:$0xff] }
   0x3   :  { %v1083_v6 = vpack.c.bf16 %v927_v5, %v926_v2  ;;  %v114_v10 = vld [vmem:[%s1412_s3] sm:$0xff]  ;;  %v1086_v12 = vpack.c.bf16 %v205_v9, %v204_v8  ;;  %v115_v13 = vld [vmem:[%s1412_s3 + $0x8] sm:$0xff] }
   0x4   :  { %1081 = vmatpush3.bf16.msra.mxu0 %v1080_v4  ;;  %v30_v11 = vld [vmem:[%s1409_s0] sm:$0xff] }
   0x5   :  { %15 = vsyncpa [#allocation4], 0  ;;  %1084 = vmatpush3.bf16.msra.mxu1 %v1083_v6  ;;  %v925_v14 = vld [vmem:[%s1409_s0 + $0x8] sm:$0xff]  ;;  %1085 = vmatprep.subr.bf16.mxu0 %v1170_v3  ;;  %v1092_v15 = vpack.c.bf16 %v115_v13, %v114_v10  ;;  %v206_v16 = vld [vmem:[%s1412_s3 + $0x30] sm:$0xff]  ;;  %vm208_vm2 = vcmask 261120   ;;  %vm857_vm3 = vcmask 64512  }
   0x6   :  { %1091 = vmatprep.subr.bf16.mxu1 %v1170_v3  ;;  %v207_v17 = vld [vmem:[%s1412_s3 + $0x38] sm:$0xff]  ;;  %v116_v18 = vld [vmem:[%s1412_s3 + $0x10] sm:$0xff]  ;;  %v923_v22 = vld [vmem:[%s1411_s2] ss:$0 sm:$0xff]  ;;  %vm880_vm5 = vcmask 7168  }
   0x7   :  { %996 = vmatmul.mubr.msk.f32.vlgmr.msra.gmra.mrb[0].mxu0 %vm40_vm1, %v30_v11  ;;  %v1089_v19 = vpack.c.bf16 %v207_v17, %v206_v16  ;;  %v117_v20 = vld [vmem:[%s1412_s3 + $0x18] sm:$0xff]  ;;  %v934_v23 = vld [vmem:[%s1410_s1 + $0x20] sm:$0xff]  ;;  %v935_v24 = vld [vmem:[%s1410_s1 + $0x28] sm:$0xff] }
   0x8   :  { %1003 = vmatmul.mubr.msk.f32.vlgmr.msra.gmra.mrb[0].mxu1 %vm40_vm1, %v925_v14  ;;  %1087 = vmatpush3.bf16.msra.mxu0 %v1086_v12  ;;  %v1095_v21 = vpack.c.bf16 %v117_v20, %v116_v18  ;;  %v929_v25 = vld [vmem:[%s1411_s2 + $0x1] ss:$0 sm:$0xff]  ;;  %v1098_v29 = vpack.c.bf16 %v935_v24, %v934_v23  ;;  %v941_v33 = vld [vmem:[%s1410_s1 + $0x30] sm:$0xff]  ;;  %v942_v34 = vld [vmem:[%s1410_s1 + $0x38] sm:$0xff] }
   0x9   :  { %1093 = vmatpush3.bf16.msra.mxu1 %v1092_v15  ;;  %1088 = vmatprep.subr.bf16.mxu0 %v1170_v3  ;;  %v933_v35 = vld [vmem:[%s1409_s0 + $0x10] sm:$0xff]  ;;  %v1107_v36 = vpack.c.bf16 %v942_v34, %v941_v33  ;;  %v940_v37 = vld [vmem:[%s1409_s0 + $0x18] sm:$0xff]  ;;  %v441_v38 = vld [vmem:[%s1412_s3 + $0x40] sm:$0xff] }
   0xa   :  { %1094 = vmatprep.subr.bf16.mxu1 %v1170_v3  ;;  %1013 = vmatprep.mubr.msk.f32.mxu0 %vm1171_vm0, %v1172_v7  ;;  %v442_v39 = vld [vmem:[%s1412_s3 + $0x48] sm:$0xff]  ;;  %v443_v41 = vld [vmem:[%s1412_s3 + $0x50] sm:$0xff]  ;;  %v444_v42 = vld [vmem:[%s1412_s3 + $0x58] sm:$0xff] }
   0xb   :  { %1024 = vmatprep.mubr.msk.f32.mxu1 %vm1171_vm0, %v1172_v7  ;;  %v1101_v40 = vpack.c.bf16 %v442_v39, %v441_v38  ;;  %v1104_v43 = vpack.c.bf16 %v444_v42, %v443_v41  ;;  %v605_v44 = vld [vmem:[%s1412_s3 + $0x60] sm:$0xff]  ;;  %v606_v45 = vld [vmem:[%s1412_s3 + $0x68] sm:$0xff]  ;;  %v607_v47 = vld [vmem:[%s1412_s3 + $0x70] sm:$0xff] }
   0xc   :  { %1090 = vmatpush3.bf16.msra.mxu0 %v1089_v19  ;;  %v1110_v46 = vpack.c.bf16 %v606_v45, %v605_v44  ;;  %v608_v48 = vld [vmem:[%s1412_s3 + $0x78] sm:$0xff]  ;;  %v937_v55 = vld [vmem:[%s1411_s2 + $0x2] ss:$0 sm:$0xff]  ;;  %v944_v59 = vld [vmem:[%s1411_s2 + $0x3] ss:$0 sm:$0xff] }
   0xd   :  { %1096 = vmatpush3.bf16.msra.mxu1 %v1095_v21  ;;  %1097 = vmatprep.subr.bf16.mxu0 %v1170_v3  ;;  %v1113_v49 = vpack.c.bf16 %v608_v48, %v607_v47  ;;  %v692_v63 = vld [vmem:[%s1414_s5] sm:$0xff]  ;;  %v693_v0 = vld [vmem:[%s1414_s5 + $0x8] sm:$0xff]  ;;  %v694_v2 = vld [vmem:[%s1414_s5 + $0x10] sm:$0xff] }
   0xe   :  { %1100 = vmatprep.subr.bf16.mxu1 %v1170_v3  ;;  %v1116_v1 = vpack.c.bf16 %v693_v0, %v692_v63  ;;  %v695_v4 = vld [vmem:[%s1414_s5 + $0x18] sm:$0xff]  ;;  %v947_v10 = vld [vmem:[%s1413_s4] ss:$0 sm:$0xff]  ;;  %s1173_s4 = smov [#allocation2]  }
   0xf   :  { %v1119_v5 = vpack.c.bf16 %v695_v4, %v694_v2  ;;  %v948_v14 = vld [vmem:[%s1415_s6] ss:$0 sm:$0xff]  ;;  %s902_s5 = sshll.u32 %s1173_s4, 4  ;;  %s903_s5 = int_to_ptr.vmem [resolvable:$true] %s902_s5 }
  0x10   :  { %s1134_s6 = scalar_lea.vmem %s903_s5, 128  ;;  %p1139_p1 = scmp.lt.s32.totalorder %s903_s5, %s903_s5 }
  0x11   :  { %p1135_p0 = scmp.ne.s32.totalorder %s903_s5, %s1134_s6  ;;  %p1140_p2 = scmp.lt.s32.totalorder %s1134_s6, %s1134_s6 }
  0x13   :  { %p1141_p3 = por %p1140_p2, %p1139_p1 }
  0x15   :  { %p1142_p4 = pnand %p1141_p3, %p1135_p0 }
  0xda   :  { %v110_v26 = vpop.f32.mrb[0].mxu0 }
  0xdb   :  { %v111_v27 = vadd.f32 %v923_v22, %v110_v26  ;;  %v200_v28 = vpop.f32.mrb[0].mxu1  ;;  %v997_v30 = vpop.f32.mrb[1].mxu0 }
  0xdc   :  { %v201_v31 = vadd.f32 %v929_v25, %v200_v28  ;;  %v1004_v32 = vpop.f32.mrb[1].mxu1  ;;  %v870_v30 = vlaneseq }
  0xdd   :  { %1025 = vmatmul.mubr.msk.f32.vlgmr.msra.gmra.mrb[2].mxu1 %vm208_vm2, %v111_v27 }
  0xde   :  { %1014 = vmatmul.mubr.msk.f32.vlgmr.msra.gmra.mrb[2].mxu0 %vm208_vm2, %v201_v31  ;;  %1042 = vmatprep.mubr.msk.f32.mxu1 %vm1171_vm0, %v1172_v7  ;;  %v871_v31 = vshrl.u32 %v870_v30, 7  ;;  %v873_v32 = vand.u32 127, %v870_v30 }
  0xdf   :  { %1099 = vmatpush3.bf16.msra.mxu0 %v1098_v29  ;;  %1031 = vmatprep.mubr.msk.f32.mxu0 %vm1171_vm0, %v1172_v7 }
  0xe0   :  { %1106 = vmatprep.subr.bf16.mxu0 %v1170_v3  ;;  %1102 = vmatpush3.bf16.msra.mxu1 %v1101_v40  ;;  %vm874_vm4 = vcmp.eq.s32.totalorder %v871_v31, %v873_v32 }
  0xe1   :  { %1103 = vmatprep.subr.bf16.mxu1 %v1170_v3 }
  0xe2   :  { %1032 = vmatmul.mubr.msk.f32.vlgmr.msra.gmra.mrb[4].mxu0 %vm40_vm1, %v933_v35 }
  0xe3   :  { %1108 = vmatpush3.bf16.msra.mxu0 %v1107_v36  ;;  %1049 = vmatprep.mubr.msk.f32.mxu0 %vm1171_vm0, %v1172_v7 }
  0xe4   :  { %1109 = vmatprep.subr.bf16.mxu0 %v1170_v3  ;;  %1105 = vmatpush3.bf16.msra.mxu1 %v1104_v43 }
  0xe5   :  { %1115 = vmatprep.subr.bf16.mxu1 %v1170_v3 }
  0xe6   :  { %1050 = vmatmul.mubr.msk.f32.vlgmr.msra.gmra.mrb[6].mxu0 %vm40_vm1, %v940_v37 }
  0xe7   :  { %1060 = vmatprep.mubr.msk.f32.mxu0 %vm1171_vm0, %v1172_v7  ;;  %1111 = vmatpush3.bf16.msra.mxu0 %v1110_v46 }
  0xe8   :  { %1112 = vmatprep.subr.bf16.mxu0 %v1170_v3 }
  0xeb   :  { %1114 = vmatpush3.bf16.msra.mxu0 %v1113_v49 }
  0xec   :  { %1074 = vmatprep.subr.mxu0 %v1172_v7 }
 0x1b0   :  { %v351_v50 = vpop.f32.mrb[2].mxu1 }
 0x1b1   :  { %v278_v51 = vpop.f32.mrb[2].mxu0  ;;  %v1026_v52 = vpop.f32.mrb[3].mxu1 }
 0x1b2   :  { %v352_v53 = vadd.f32 %v351_v50, %v278_v51  ;;  %v1015_v54 = vpop.f32.mrb[3].mxu0 }
 0x1b5   :  { %v437_v56 = vpop.f32.mrb[4].mxu0 }
 0x1b6   :  { %v438_v57 = vadd.f32 %v937_v55, %v437_v56  ;;  %v1033_v58 = vpop.f32.mrb[5].mxu0 }
 0x1b8   :  { %1043 = vmatmul.mubr.msk.f32.vlgmr.msra.gmra.mrb[4].mxu1 %vm208_vm2, %v438_v57 }
 0x1b9   :  { %v601_v60 = vpop.f32.mrb[6].mxu0  ;;  %1071 = vmatprep.mubr.msk.f32.mxu1 %vm1171_vm0, %v1172_v7  ;;  %1117 = vmatpush3.bf16.msra.mxu1 %v1116_v1 }
 0x1ba   :  { %v602_v61 = vadd.f32 %v944_v59, %v601_v60  ;;  %v1051_v62 = vpop.f32.mrb[7].mxu0  ;;  %1118 = vmatprep.subr.bf16.mxu1 %v1170_v3 }
 0x1bc   :  { %1061 = vmatmul.mubr.msk.f32.vlgmr.msra.gmra.mrb[8].mxu0 %vm208_vm2, %v602_v61 }
 0x1bd   :  { %1076 = vmatprep.mubr.msk.f32.mxu0 %vm1171_vm0, %v1172_v7  ;;  %1120 = vmatpush3.bf16.msra.mxu1 %v1119_v5 }
 0x28b   :  { %v514_v6 = vpop.f32.mrb[4].mxu1 }
 0x28c   :  { %v518_v7 = vadd.f32 %v514_v6, %v352_v53  ;;  %v1044_v8 = vpop.f32.mrb[5].mxu1 }
 0x28f   :  { %v678_v9 = vpop.f32.mrb[8].mxu0 }
 0x290   :  { %v682_v11 = vadd.f32 %v678_v9, %v518_v7  ;;  %v1062_v3 = vpop.f32.mrb[9].mxu0 }
 0x292   :  { %v690_v12 = vadd.f32 %v947_v10, %v682_v11 }
 0x294   :  { %v691_v13 = vmax.f32 %v690_v12, 0.0 }
 0x296   :  { %1072 = vmatmul.mubr.msk.f32.vlgmr.msra.gmra.mrb[6].mxu1 %vm208_vm2, %v691_v13 }
 0x369   :  { %v772_v15 = vpop.f32.mrb[6].mxu1 }
 0x36a   :  { %v773_v16 = vadd.f32 %v948_v14, %v772_v15  ;;  %v1073_v17 = vpop.f32.mrb[7].mxu1 }
 0x36c   :  { %776 = vst.msk [vmem:[#allocation2] sm:$0xff] %vm208_vm2, %v773_v16  ;;  %v777_v18 = vmul.f32 %v773_v16, %v773_v16 }
 0x36e   :  { %v778_v19 = vsel %vm208_vm2, %v777_v18, 0.0 }
 0x36f   :  { %779 = vadd.xlane.f32.xlu0 %v778_v19 }
 0x3fc   :  { %v780_v20 = vpop.xlane.xlu0 %779 }
 0x3fd   :  { %v781_v21 = vmax.f32 %v780_v20, 1e-24 }
 0x3ff   :  { %1128 = vrsqrt.f32 %v781_v21 }
 0x409   :  { %v1129_v22 = vpop.eup %1128 }
 0x40a   :  { %v783_v23 = vmul.f32 %v1129_v22, %v773_v16 }
 0x40c   :  { %1075 = vmatpush3.xpose.msk.msra.mxu0 %vm208_vm2, %v783_v23 }
 0x40f   :  { %1077 = vmatmul.mubr.msk.f32.vlgmr.msra.gmra.mrb[10].mxu0 %vm208_vm2, %v783_v23 }
 0x4e2   :  { %v853_v24 = vpop.f32.mrb[10].mxu0 }
 0x4e3   :  { %v1078_v25 = vpop.f32.mrb[11].mxu0  ;;  %v858_v26 = vsel %vm857_vm3, %v853_v24, -inf  ;;  %v875_v35 = vsel %vm874_vm4, %v853_v24, 0.0 }
 0x4e4   :  { %859 = vmax.xlane.f32.xlu0 %v858_v26  ;;  %v876_v36 = vsel %vm857_vm3, %v875_v35, 0.0 }
 0x571   :  { %v860_v27 = vpop.xlane.xlu0 %859 }
 0x572   :  { %v861_v28 = vsub.f32 %v853_v24, %v860_v27 }
 0x574   :  { %v862_v29 = vmul.f32 1.442695, %v861_v28 }
 0x576   :  { %1130 = vpow2.f32 %v862_v29 }
 0x580   :  { %v1131_v33 = vpop.eup %1130 }
 0x581   :  { %v864_v34 = vsel %vm857_vm3, %v1131_v33, 0.0 }
 0x582   :  { %865 = vadd.xlane.f32.xlu1 %v864_v34 }
 0x586   :  { %877 = vadd.xlane.f32.xlu1 %v876_v36 }
 0x60f   :  { %v866_v37 = vpop.xlane.xlu1 %865 }
 0x610   :  { %1132 = vlog2.f32 %v866_v37 }
 0x613   :  { %v878_v41 = vpop.xlane.xlu1 %877 }
 0x61a   :  { %v1133_v38 = vpop.eup %1132 }
 0x61b   :  { %v868_v39 = vmul.f32 0.6931472, %v1133_v38 }
 0x61d   :  { %v869_v40 = vadd.f32 %v868_v39, %v860_v27 }
 0x61f   :  { %v879_v42 = vsub.f32 %v869_v40, %v878_v41 }
 0x621   :  { %v881_v43 = vsel %vm880_vm5, %v879_v42, 0.0 }
 0x622   :  { %882 = vadd.xlane.f32.xlu0 %v881_v43 }
 0x623   :  { %1145 = shalt.err (!%p1142_p4)
}
 0x624   :  { %s1146_s11 = scalar_lea.hbm %s1416_s7, 128 }
 0x625   :  { %p1147_p5 = scmp.ne.s32.totalorder %s1416_s7, %s1146_s11  ;;  %p1150_p6 = scmp.lt.u32.totalorder %s1146_s11, %s1416_s7 }
 0x627   :  { %p1152_p7 = pnand %p1150_p6, %p1147_p5 }
 0x629   :  { %1155 = shalt.err (!%p1152_p7)
}
 0x62a   :  { %905 = dma.vmem_to_hbm [thread:$0]  %s903_s5, 128, %s1416_s7, [#allocation3]  }
 0x62b   :  { %s1156_s21 = scalar_lea.hbm %s1417_s8, 16 }
 0x62c   :  { %p1157_p8 = scmp.ne.s32.totalorder %s1417_s8, %s1156_s21  ;;  %p1160_p9 = scmp.lt.u32.totalorder %s1156_s21, %s1417_s8 }
 0x62e   :  { %p1162_p10 = pnand %p1160_p9, %p1157_p8 }
 0x6af   :  { %v883_v44 = vpop.xlane.xlu0 %882 }
 0x6b0   :  { %v884_v45 = vrot.slane %v883_v44, 4 }
 0x6b2   :  { %v885_v46 = vadd.f32 %v884_v45, %v883_v44 }
 0x6b4   :  { %v886_v47 = vrot.slane %v885_v46, 2 }
 0x6b6   :  { %v887_v48 = vadd.f32 %v886_v47, %v885_v46 }
 0x6b8   :  { %v888_v49 = vrot.slane %v887_v48, 1 }
 0x6ba   :  { %v889_v50 = vadd.f32 %v888_v49, %v887_v48 }
 0x6bc   :  { %1121 = vpush %v889_v50 }
 0x6ed   :  { %s1122_s18 = spop %1121 }
 0x6ee   :  { %s893_s19 = smul.f32 0.125, %s1122_s18 }
 0x6f0   :  { %895 = sst [smem:[#allocation5]] %s893_s19 }
 0x6f1   :  { %1165 = shalt.err (!%p1162_p10)
}
 0x6f2   :  { %s1174_s1 = smov [#allocation5]  }
 0x6f3   :  { %913 = dma.smem_to_hbm %s1174_s1, 16, %s1417_s8, [#allocation4]  }
 0x6f4   :  { %1166 = dma.done.wait [#allocation3], 128  }
 0x6f5   :  { %1167 = vsyncadd [#allocation3], 4294967168 }
 0x6f6   :  { %1168 = dma.done.wait [#allocation4], 16  }
 0x6f7   :  { %1169 = vsyncadd [#allocation4], 4294967280 }
 0x6f8   :  { %920 = sfence }
 0x6f9   :  { %921 = vsyncpa [#allocation3], 1 }
 0x6fa   :  { %922 = vsyncpa [#allocation4], 1 }

</bundles_post_ra>
